<compile_context>
chip_gen: v5e
topology: v5e:2x2
jax: 0.10.0
libtpu: 0.0.40
codegen_flags: <defaults>
</compile_context>

<pallas_src>
import functools

import jax
import jax.numpy as jnp
from jax.experimental import pallas as pl
from jax.experimental.pallas import tpu as pltpu


def _round_up(x, m):
    return ((x + m - 1) // m) * m


# ---------------------------------------------------------------------------
# Fused Pallas kernel: full encoder forward in one call
# ---------------------------------------------------------------------------
def _encoder_fused_kernel(a_ref, w_ref, b_ref, x_ref, eps_ref, out_ref, *,
                          n_hidden, z_dim, f_pad, scale):
    """Whole VGAE-encoder forward.

    a_ref   [N, N]                 bf16  normalized adjacency A_hat
    w_ref   [(n_hidden+1)*f_pad, f_pad]  bf16  packed weight slab (layer k = rows
                                               [k*f_pad, (k+1)*f_pad), zero-padded;
                                               last block = [W_mu | W_logvar])
    b_ref   [n_hidden+1, f_pad]    f32   packed bias slab (row k = bias of layer k)
    x_ref   [N, f_pad]             f32   node features (zero-padded to f_pad lanes)
    eps_ref [N, z_dim]             f32   reparameterization noise
    out_ref [N, 3*z_dim]           f32   packed output [mu | log_var | z]
    """
    a = a_ref[...]                      # bf16
    h = x_ref[...]                      # f32 activations, stays f32 element-wise
    n_layers = n_hidden + 1             # hidden GCN layers + fused mu/logvar head

    for k in range(n_layers):
        w = w_ref[k * f_pad:(k + 1) * f_pad, :]          # static, aligned slice (bf16)
        b = b_ref[k:k + 1, :]                            # [1, f_pad] f32
        # GCNConv: A_hat @ (h @ W) + b  -- bf16 MXU operands, f32 accumulation.
        xw = jnp.dot(h.astype(jnp.bfloat16), w, preferred_element_type=jnp.float32)
        h = jnp.dot(a, xw.astype(jnp.bfloat16), preferred_element_type=jnp.float32) + b
        if k < n_hidden:                                 # hidden layers: ReLU
            h = jnp.maximum(h, 0.0)
        if k < n_hidden - 1:
            # TODO(synk): F.dropout is identity (eval mode); training dropout not modeled.
            # F.normalize(x, p=2, dim=1) * scaling_factor via rsqrt (EUP), scale folded in.
            ssum = jnp.sum(h * h, axis=1, keepdims=True)
            h = h * (scale * jax.lax.rsqrt(jnp.maximum(ssum, 1e-24)))

    # h now holds the fused head output: [mu | log_var] in the first 2*z_dim lanes.
    mu = h[:, :z_dim]
    log_var = h[:, z_dim:2 * z_dim]
    z = mu + jnp.exp(0.5 * log_var) * eps_ref[...]

    # Store head lanes directly (no lane-dim concatenate), then z.
    out_ref[:, :2 * z_dim] = h[:, :2 * z_dim]
    out_ref[:, 2 * z_dim:] = z


def encoder_forward(w_slab, b_slab, a_hat_bf16, x, eps, *,
                    n_hidden, z_dim, f_pad, scaling_factor=1.0):
    """Single fused pallas_call for the whole encoder forward pass."""
    n, x_dim = x.shape
    if x_dim < f_pad:                                    # trace-time no-op when equal
        x = jnp.pad(x, ((0, 0), (0, f_pad - x_dim)))

    kernel = functools.partial(
        _encoder_fused_kernel, n_hidden=n_hidden, z_dim=z_dim, f_pad=f_pad,
        scale=float(scaling_factor))

    vmem = pl.BlockSpec(memory_space=pltpu.MemorySpace.VMEM)
    out = pl.pallas_call(
        kernel,
        out_shape=jax.ShapeDtypeStruct((n, 3 * z_dim), jnp.float32),
        in_specs=[vmem] * 5,
        out_specs=vmem,
    )(a_hat_bf16, w_slab, b_slab, x, eps)

    mu = out[:, :z_dim]
    log_var = out[:, z_dim:2 * z_dim]
    z = out[:, 2 * z_dim:]
    return z, mu, log_var


# ---------------------------------------------------------------------------
# Parameter packing (done ONCE at init, outside the per-call path)
# ---------------------------------------------------------------------------
def pack_encoder_params(params, x_dim, z_dim):
    """Pack all GCN weights/biases into two slabs the kernel slices statically."""
    h_outs = [w.shape[1] for (w, _) in params["hidden"]]
    f_pad = _round_up(max([x_dim] + h_outs + [2 * z_dim]), 8)
    n_hidden = len(params["hidden"])

    w_mu, b_mu = params["mu"]
    w_lv, b_lv = params["log_var"]
    w_head = jnp.concatenate([w_mu, w_lv], axis=1)       # [h_last, 2*z_dim]
    b_head = jnp.concatenate([b_mu, b_lv])               # [2*z_dim]

    ws = [w for (w, _) in params["hidden"]] + [w_head]
    bs = [b for (_, b) in params["hidden"]] + [b_head]

    w_blocks, b_rows = [], []
    for w, b in zip(ws, bs):
        fin, fout = w.shape
        w_blocks.append(jnp.zeros((f_pad, f_pad), jnp.float32).at[:fin, :fout].set(w))
        b_rows.append(jnp.zeros((f_pad,), jnp.float32).at[:fout].set(b))

    w_slab = jnp.concatenate(w_blocks, axis=0).astype(jnp.bfloat16)  # MXU operands -> bf16
    b_slab = jnp.stack(b_rows, axis=0)                               # biases stay f32
    meta = dict(n_hidden=n_hidden, z_dim=z_dim, f_pad=f_pad)
    return w_slab, b_slab, meta


# ---------------------------------------------------------------------------
# Plain-JAX glue
# ---------------------------------------------------------------------------
def build_norm_adj(edge_index, num_nodes):
    """Dense D^{-1/2}(A + I)D^{-1/2} matching PyG GCNConv normalization."""
    src, dst = edge_index[0], edge_index[1]
    a = jnp.zeros((num_nodes, num_nodes), jnp.float32)
    a = a.at[dst, src].add(1.0)                       # message j -> i at A[i, j]
    a = a + jnp.eye(num_nodes, dtype=jnp.float32)     # self loops
    deg = jnp.sum(a, axis=1)
    dinv = jax.lax.rsqrt(jnp.maximum(deg, 1e-12))
    return a * dinv[:, None] * dinv[None, :]


def glorot(key, fin, fout):
    limit = jnp.sqrt(6.0 / (fin + fout))
    return jax.random.uniform(key, (fin, fout), jnp.float32, -limit, limit)


def init_encoder_params(key, x_dim, h_dims, z_dim):
    neurons = [x_dim] + list(h_dims)
    params = {"hidden": [], "mu": None, "log_var": None}
    for i in range(1, len(neurons)):
        key, kw = jax.random.split(key)
        params["hidden"].append(
            (glorot(kw, neurons[i - 1], neurons[i]),
             jnp.zeros((neurons[i],), jnp.float32)))
    key, kmu, klv = jax.random.split(key, 3)
    params["mu"] = (glorot(kmu, h_dims[-1], z_dim), jnp.zeros((z_dim,), jnp.float32))
    params["log_var"] = (glorot(klv, h_dims[-1], z_dim), jnp.zeros((z_dim,), jnp.float32))
    return params


def encoder_forward_ref(params, x, a_hat, eps, *, scaling_factor=1.0, bf16=False):
    """Pure-JAX reference.  bf16=True mirrors the kernel's MXU-operand casts exactly."""
    def cast(v):
        return v.astype(jnp.bfloat16) if bf16 else v

    a = cast(a_hat)
    h = x
    n_hidden = len(params["hidden"])
    for k, (w, b) in enumerate(params["hidden"]):
        xw = jnp.dot(cast(h), cast(w), preferred_element_type=jnp.float32)
        h = jnp.dot(a, cast(xw), preferred_element_type=jnp.float32) + b
        h = jnp.maximum(h, 0.0)
        if k < n_hidden - 1:
            ssum = jnp.sum(h * h, axis=1, keepdims=True)
            h = h * (scaling_factor * jax.lax.rsqrt(jnp.maximum(ssum, 1e-24)))
    w_mu, b_mu = params["mu"]
    w_lv, b_lv = params["log_var"]
    mu = jnp.dot(a, cast(jnp.dot(cast(h), cast(w_mu),
                                 preferred_element_type=jnp.float32)),
                 preferred_element_type=jnp.float32) + b_mu
    log_var = jnp.dot(a, cast(jnp.dot(cast(h), cast(w_lv),
                                      preferred_element_type=jnp.float32)),
                      preferred_element_type=jnp.float32) + b_lv
    z = mu + jnp.exp(0.5 * log_var) * eps
    return z, mu, log_var


# ---------------------------------------------------------------------------
# Driver
# ---------------------------------------------------------------------------
if __name__ == "__main__":
    key = jax.random.PRNGKey(0)

    N = 16                       # number of graph nodes
    x_dim, h_dims, z_dim = 32, [32, 16], 8
    scaling_factor = 1.0

    # deterministic undirected ring graph: edge_index shape [2, 2N]
    s = jnp.arange(N, dtype=jnp.int32)
    d = (s + 1) % N
    edge_index = jnp.stack(
        [jnp.concatenate([s, d]), jnp.concatenate([d, s])], axis=0)

    key, kx, keps, kp = jax.random.split(key, 4)
    x = jax.random.normal(kx, (N, x_dim), jnp.float32)
    eps = jax.random.normal(keps, (N, z_dim), jnp.float32)   # reparameterization noise

    params = init_encoder_params(kp, x_dim, h_dims, z_dim)
    a_hat = build_norm_adj(edge_index, N)
    a_hat_bf16 = a_hat.astype(jnp.bfloat16)                  # cast once (MXU operand)

    # One-time packing of all layer parameters into two slabs.
    w_slab, b_slab, meta = pack_encoder_params(params, x_dim, z_dim)

    # jit so the output slicing fuses with the fused kernel call.
    fwd = jax.jit(functools.partial(encoder_forward, **meta,
                                    scaling_factor=scaling_factor))

    z, mu, log_var = fwd(w_slab, b_slab, a_hat_bf16, x, eps)
    jax.block_until_ready((z, mu, log_var))

    # Tight check against a pure-JAX reference that mirrors the kernel's bf16 MXU casts.
    z_r, mu_r, lv_r = encoder_forward_ref(
        params, x, a_hat_bf16, eps, scaling_factor=scaling_factor, bf16=True)
    assert z.shape == (N, z_dim) and mu.shape == (N, z_dim) and log_var.shape == (N, z_dim)
    assert jnp.allclose(mu, mu_r, atol=1e-3, rtol=1e-3)
    assert jnp.allclose(log_var, lv_r, atol=1e-3, rtol=1e-3)
    assert jnp.allclose(z, z_r, atol=1e-3, rtol=1e-3)

    # Loose semantic check against the full-f32 reference (bf16 MXU operands only
    # perturb results at the ~1% level at these magnitudes).
    z_f, mu_f, lv_f = encoder_forward_ref(
        params, x, a_hat, eps, scaling_factor=scaling_factor, bf16=False)
    assert jnp.max(jnp.abs(mu - mu_f)) < 0.25
    assert jnp.max(jnp.abs(log_var - lv_f)) < 0.25
    assert jnp.max(jnp.abs(z - z_f)) < 0.25

    print("KERNEL_OK")
</pallas_src>

<mosaic_0001>
module attributes {stable_mosaic.version = 11 : i64} {
  func.func @_encoder_fused_kernel(%arg0: memref<16x16xbf16, #tpu.memory_space<vmem>>, %arg1: memref<96x32xbf16, #tpu.memory_space<vmem>>, %arg2: memref<3x32xf32, #tpu.memory_space<vmem>>, %arg3: memref<16x32xf32, #tpu.memory_space<vmem>>, %arg4: memref<16x8xf32, #tpu.memory_space<vmem>>, %arg5: memref<16x24xf32, #tpu.memory_space<vmem>>) attributes {dimension_semantics = [], scalar_prefetch = 0 : i64, scratch_operands = 0 : i64, tpu.core_type = #tpu.core_type<tc>} {
    %c0 = arith.constant 0 : index
    %c0_0 = arith.constant 0 : index
    %0 = vector.load %arg0[%c0, %c0_0] : memref<16x16xbf16, #tpu.memory_space<vmem>>, vector<16x16xbf16>
    %c0_1 = arith.constant 0 : index
    %c0_2 = arith.constant 0 : index
    %1 = vector.load %arg3[%c0_1, %c0_2] : memref<16x32xf32, #tpu.memory_space<vmem>>, vector<16x32xf32>
    %c0_3 = arith.constant 0 : index
    %c0_4 = arith.constant 0 : index
    %2 = vector.load %arg1[%c0_3, %c0_4] : memref<96x32xbf16, #tpu.memory_space<vmem>>, vector<32x32xbf16>
    %c0_5 = arith.constant 0 : index
    %c0_6 = arith.constant 0 : index
    %3 = vector.load %arg2[%c0_5, %c0_6] : memref<3x32xf32, #tpu.memory_space<vmem>>, vector<1x32xf32>
    %4 = arith.truncf %1 : vector<16x32xf32> to vector<16x32xbf16>
    %cst = arith.constant dense<0.000000e+00> : vector<16x32xf32>
    %5 = tpu.matmul %4, %2, %cst {dimension_numbers = #tpu.dot_dimension_numbers<[1], [0], [0], [1], [0, 0, 1, 1], [], []>} : vector<16x32xbf16>, vector<32x32xbf16>, vector<16x32xf32> -> vector<16x32xf32>
    %6 = arith.truncf %5 : vector<16x32xf32> to vector<16x32xbf16>
    %cst_7 = arith.constant dense<0.000000e+00> : vector<16x32xf32>
    %7 = tpu.matmul %0, %6, %cst_7 {dimension_numbers = #tpu.dot_dimension_numbers<[1], [0], [0], [1], [0, 0, 1, 1], [], []>} : vector<16x16xbf16>, vector<16x32xbf16>, vector<16x32xf32> -> vector<16x32xf32>
    %8 = vector.broadcast %3 : vector<1x32xf32> to vector<16x32xf32>
    %9 = arith.addf %7, %8 : vector<16x32xf32>
    %cst_8 = arith.constant 0.000000e+00 : f32
    %10 = vector.broadcast %cst_8 : f32 to vector<16x32xf32>
    %11 = arith.maximumf %9, %10 : vector<16x32xf32>
    %12 = arith.mulf %11, %11 : vector<16x32xf32>
    %cst_9 = arith.constant dense<0.000000e+00> : vector<16xf32>
    %13 = vector.multi_reduction <add>, %12, %cst_9 [1] : vector<16x32xf32> to vector<16xf32>
    %14 = vector.shape_cast %13 : vector<16xf32> to vector<16x1xf32>
    %cst_10 = arith.constant 1.000000e-24 : f32
    %15 = vector.broadcast %cst_10 : f32 to vector<16x1xf32>
    %16 = arith.maximumf %14, %15 : vector<16x1xf32>
    %17 = math.rsqrt %16 : vector<16x1xf32>
    %cst_11 = arith.constant 1.000000e+00 : f32
    %18 = vector.broadcast %cst_11 : f32 to vector<16x1xf32>
    %19 = arith.mulf %18, %17 : vector<16x1xf32>
    %20 = vector.broadcast %19 : vector<16x1xf32> to vector<16x32xf32>
    %21 = arith.mulf %11, %20 : vector<16x32xf32>
    %c32 = arith.constant 32 : index
    %c0_12 = arith.constant 0 : index
    %22 = vector.load %arg1[%c32, %c0_12] : memref<96x32xbf16, #tpu.memory_space<vmem>>, vector<32x32xbf16>
    %c1 = arith.constant 1 : index
    %c0_13 = arith.constant 0 : index
    %23 = vector.load %arg2[%c1, %c0_13] : memref<3x32xf32, #tpu.memory_space<vmem>>, vector<1x32xf32>
    %24 = arith.truncf %21 : vector<16x32xf32> to vector<16x32xbf16>
    %cst_14 = arith.constant dense<0.000000e+00> : vector<16x32xf32>
    %25 = tpu.matmul %24, %22, %cst_14 {dimension_numbers = #tpu.dot_dimension_numbers<[1], [0], [0], [1], [0, 0, 1, 1], [], []>} : vector<16x32xbf16>, vector<32x32xbf16>, vector<16x32xf32> -> vector<16x32xf32>
    %26 = arith.truncf %25 : vector<16x32xf32> to vector<16x32xbf16>
    %cst_15 = arith.constant dense<0.000000e+00> : vector<16x32xf32>
    %27 = tpu.matmul %0, %26, %cst_15 {dimension_numbers = #tpu.dot_dimension_numbers<[1], [0], [0], [1], [0, 0, 1, 1], [], []>} : vector<16x16xbf16>, vector<16x32xbf16>, vector<16x32xf32> -> vector<16x32xf32>
    %28 = vector.broadcast %23 : vector<1x32xf32> to vector<16x32xf32>
    %29 = arith.addf %27, %28 : vector<16x32xf32>
    %cst_16 = arith.constant 0.000000e+00 : f32
    %30 = vector.broadcast %cst_16 : f32 to vector<16x32xf32>
    %31 = arith.maximumf %29, %30 : vector<16x32xf32>
    %c64 = arith.constant 64 : index
    %c0_17 = arith.constant 0 : index
    %32 = vector.load %arg1[%c64, %c0_17] : memref<96x32xbf16, #tpu.memory_space<vmem>>, vector<32x32xbf16>
    %c2 = arith.constant 2 : index
    %c0_18 = arith.constant 0 : index
    %33 = vector.load %arg2[%c2, %c0_18] : memref<3x32xf32, #tpu.memory_space<vmem>>, vector<1x32xf32>
    %34 = arith.truncf %31 : vector<16x32xf32> to vector<16x32xbf16>
    %cst_19 = arith.constant dense<0.000000e+00> : vector<16x32xf32>
    %35 = tpu.matmul %34, %32, %cst_19 {dimension_numbers = #tpu.dot_dimension_numbers<[1], [0], [0], [1], [0, 0, 1, 1], [], []>} : vector<16x32xbf16>, vector<32x32xbf16>, vector<16x32xf32> -> vector<16x32xf32>
    %36 = arith.truncf %35 : vector<16x32xf32> to vector<16x32xbf16>
    %cst_20 = arith.constant dense<0.000000e+00> : vector<16x32xf32>
    %37 = tpu.matmul %0, %36, %cst_20 {dimension_numbers = #tpu.dot_dimension_numbers<[1], [0], [0], [1], [0, 0, 1, 1], [], []>} : vector<16x16xbf16>, vector<16x32xbf16>, vector<16x32xf32> -> vector<16x32xf32>
    %38 = vector.broadcast %33 : vector<1x32xf32> to vector<16x32xf32>
    %39 = arith.addf %37, %38 : vector<16x32xf32>
    %40 = vector.extract_strided_slice %39 {offsets = [0, 0], sizes = [16, 8], strides = [1, 1]} : vector<16x32xf32> to vector<16x8xf32>
    %41 = vector.extract_strided_slice %39 {offsets = [0, 8], sizes = [16, 8], strides = [1, 1]} : vector<16x32xf32> to vector<16x8xf32>
    %cst_21 = arith.constant 5.000000e-01 : f32
    %42 = vector.broadcast %cst_21 : f32 to vector<16x8xf32>
    %43 = arith.mulf %42, %41 : vector<16x8xf32>
    %44 = math.exp %43 : vector<16x8xf32>
    %c0_22 = arith.constant 0 : index
    %c0_23 = arith.constant 0 : index
    %45 = vector.load %arg4[%c0_22, %c0_23] : memref<16x8xf32, #tpu.memory_space<vmem>>, vector<16x8xf32>
    %46 = arith.mulf %44, %45 : vector<16x8xf32>
    %47 = arith.addf %40, %46 : vector<16x8xf32>
    %48 = vector.extract_strided_slice %39 {offsets = [0, 0], sizes = [16, 16], strides = [1, 1]} : vector<16x32xf32> to vector<16x16xf32>
    %c0_24 = arith.constant 0 : index
    %c0_25 = arith.constant 0 : index
    %49 = vector.load %arg5[%c0_24, %c0_25] : memref<16x24xf32, #tpu.memory_space<vmem>>, vector<16x16xf32>
    tpu.vector_store %arg5[%c0_24, %c0_25], %48 {strides = array<i32>} : memref<16x24xf32, #tpu.memory_space<vmem>>, vector<16x16xf32>,
    %c0_26 = arith.constant 0 : index
    %c16 = arith.constant 16 : index
    %50 = vector.load %arg5[%c0_26, %c16] : memref<16x24xf32, #tpu.memory_space<vmem>>, vector<16x8xf32>
    tpu.vector_store %arg5[%c0_26, %c16], %47 {strides = array<i32>} : memref<16x24xf32, #tpu.memory_space<vmem>>, vector<16x8xf32>,
    return
  }
}

</mosaic_0001>

<bundles_post_ra>
// kernel: encoder_forward.1
= control target key start
LH: loop header
LB: loop body
LE: loop exit
PB: predicated region body
PF: predicated region fallthrough
CT: control target
= control target key end

     0   :  { %vm43_vm0 = vcmask 261120   ;;  %vm68_vm1 = vcmask 130048   ;;  %s324_s15 = smov 8   ;;  %s326_s22 = smov 16   ;;  %vm262_vm8 = vcmask 195712   ;;  %s426_s1 = inlined_call_operand.vmem [shape: bf16[96,32], index: 1, kind: input, shape index: {}]   ;;  %s427_s3 = inlined_call_operand.vmem [shape: f32[16,32], index: 3, kind: input, shape index: {}]   ;;  %s428_s2 = inlined_call_operand.vmem [shape: f32[3,32], index: 2, kind: input, shape index: {}]   ;;  %s429_s0 = inlined_call_operand.vmem [shape: bf16[16,16], index: 0, kind: input, shape index: {}]   ;;  %s430_s4 = inlined_call_operand.vmem [shape: f32[16,8], index: 4, kind: input, shape index: {}]   ;;  %s431_s5 = inlined_call_operand.vmem [shape: f32[16,24], index: 5, kind: output, shape index: {}]  }
   0x1   :  { %v305_v0 = vld [vmem:[%s426_s1 + $0x8] sm:$0xff]  ;;  %v304_v1 = vld [vmem:[%s426_s1] sm:$0xff]  ;;  %v307_v20 = vld [vmem:[%s426_s1 + $0x18] sm:$0xff] }
   0x2   :  { %53 = vmatpush.bf16.msra.mxu0 %v305_v0  ;;  %v23_v2 = vld [vmem:[%s427_s3] sm:$0xff]  ;;  %v24_v3 = vld [vmem:[%s427_s3 + $0x8] sm:$0xff]  ;;  %147 = vmatpush.bf16.msra.mxu2 %v307_v20  ;;  %v306_v21 = vld [vmem:[%s426_s1 + $0x10] sm:$0xff] }
   0x3   :  { %v30_v4 = vpack.c.bf16 %v24_v3, %v23_v2  ;;  %v373_v8 = vld [vmem:[%s429_s0] sm:$0xff]  ;;  %v309_v46 = vld [vmem:[%s426_s1 + $0x28] sm:$0xff] }
   0x4   :  { %v313_v9 = vld [vmem:[%s428_s2] ss:$0 sm:$0xff]  ;;  %v314_v49 = vld [vmem:[%s428_s2 + $0x1] ss:$0 sm:$0xff]  ;;  %v231_v57 = vld [vmem:[%s430_s4 + $0x8] sm:$0xff] }
   0x5   :  { %v308_v47 = vld [vmem:[%s426_s1 + $0x20] sm:$0xff] }
   0x6   :  { %54 = vmatpush.bf16.msra.mxu0 %v304_v1  ;;  %148 = vmatpush.bf16.msra.mxu2 %v306_v21  ;;  %v230_v56 = vld [vmem:[%s430_s4] sm:$0xff] }
   0x7   :  { %234 = vrot.lane.b32.xlu1 %v230_v56, %s324_s15  ;;  %v315_v61 = vld [vmem:[%s428_s2 + $0x2] ss:$0 sm:$0xff]  ;;  %s325_s2 = smov 120  }
   0x9   :  { %277 = vmatmul.msk.bf16.vlgmr.msra.gmra.mxu0 %vm43_vm0, %v30_v4 }
   0xf   :  { %236 = vrot.lane.b32.xlu1 %v231_v57, %s324_s15 }
  0x79   :  { %v235_v4 = vpop.permute.xlu1 %234 }
  0x86   :  { %v56_v5 = vpop.f32.mrf.mxu0 }
  0x8e   :  { %v58_v6 = vpop.f32.mrf.mxu0 }
  0x8f   :  { %v61_v7 = vpack.c.bf16 %v58_v6, %v56_v5 }
  0x91   :  { %79 = vmatpush.bf16.msra.mxu1 %v61_v7 }
  0x94   :  { %282 = vmatmul.msk.bf16.vlgmr.msra.gmra.mxu1 %vm68_vm1, %v373_v8 }
  0x95   :  { %200 = vmatpush.bf16.msrb.mxu1 %v309_v46 }
  0x99   :  { %201 = vmatpush.bf16.msrb.mxu1 %v308_v47 }
 0x111   :  { %v81_v10 = vpop.f32.mrf.mxu1 }
 0x112   :  { %v82_v11 = vadd.f32 %v313_v9, %v81_v10 }
 0x114   :  { %v86_v12 = vmax.f32 %v82_v11, 0.0 }
 0x116   :  { %v88_v13 = vmul.f32 %v86_v12, %v86_v12 }
 0x118   :  { %v90_v14 = vsel %vm43_vm0, %v88_v13, 0.0 }
 0x119   :  { %v83_v15 = vpop.f32.mrf.mxu1  ;;  %91 = vadd.xlane.f32.xlu0 %v90_v14 }
 0x11a   :  { %v84_v16 = vadd.f32 %v313_v9, %v83_v15  ;;  %v237_v9 = vpop.permute.xlu1 %236 }
 0x11c   :  { %v87_v17 = vmax.f32 %v84_v16, 0.0 }
 0x11e   :  { %v89_v18 = vmul.f32 %v87_v17, %v87_v17 }
 0x120   :  { %v93_v19 = vsel %vm43_vm0, %v89_v18, 0.0 }
 0x121   :  { %94 = vadd.xlane.f32.xlu0 %v93_v19 }
 0x18c   :  { %v92_v22 = vpop.xlane.xlu0 %91 }
 0x18d   :  { %v96_v23 = vmax.f32 %v92_v22, 1e-24 }
 0x18f   :  { %316 = vrsqrt.f32 %v96_v23  ;;  %vm104_vm3 = vweird.f32 %v96_v23 }
 0x194   :  { %v95_v24 = vpop.xlane.xlu0 %94 }
 0x195   :  { %v317_v25 = vpop.eup %316  ;;  %v97_v26 = vmax.f32 %v95_v24, 1e-24 }
 0x196   :  { %v99_v27 = vmul.f32 %v317_v25, %v96_v23  ;;  %vm105_vm2 = vweird.f32 %v317_v25 }
 0x197   :  { %318 = vrsqrt.f32 %v97_v26  ;;  %vm106_vm5 = vmor %vm104_vm3, %vm105_vm2  ;;  %vm114_vm6 = vweird.f32 %v97_v26 }
 0x198   :  { %v100_v28 = vmul.f32 %v317_v25, %v99_v27 }
 0x19a   :  { %v101_v29 = vmul.f32 0.5, %v100_v28 }
 0x19c   :  { %v102_v31 = vsub.f32 1.5, %v101_v29 }
 0x19d   :  { %v319_v30 = vpop.eup %318 }
 0x19e   :  { %v109_v32 = vmul.f32 %v319_v30, %v97_v26  ;;  %v103_v34 = vmul.f32 %v317_v25, %v102_v31  ;;  %vm115_vm4 = vweird.f32 %v319_v30 }
 0x19f   :  { %vm116_vm7 = vmor %vm114_vm6, %vm115_vm4 }
 0x1a0   :  { %v110_v33 = vmul.f32 %v319_v30, %v109_v32  ;;  %v107_v38 = vsel %vm106_vm5, %v317_v25, %v103_v34 }
 0x1a1   :  { %v118_v40 = vmul.f32 %v107_v38, %v86_v12 }
 0x1a2   :  { %v111_v35 = vmul.f32 0.5, %v110_v33 }
 0x1a4   :  { %v112_v36 = vsub.f32 1.5, %v111_v35 }
 0x1a6   :  { %v113_v37 = vmul.f32 %v319_v30, %v112_v36 }
 0x1a8   :  { %v117_v39 = vsel %vm116_vm7, %v319_v30, %v113_v37 }
 0x1a9   :  { %v119_v41 = vmul.f32 %v117_v39, %v87_v17 }
 0x1ab   :  { %v125_v42 = vpack.c.bf16 %v119_v41, %v118_v40 }
 0x1ad   :  { %291 = vmatmul.msk.bf16.vlgmr.msra.gmra.mxu2 %vm43_vm0, %v125_v42 }
 0x230   :  { %v150_v43 = vpop.f32.mrf.mxu2 }
 0x238   :  { %v152_v44 = vpop.f32.mrf.mxu2 }
 0x239   :  { %v155_v45 = vpack.c.bf16 %v152_v44, %v150_v43 }
 0x23b   :  { %164 = vmatpush.bf16.msra.mxu3 %v155_v45 }
 0x23e   :  { %292 = vmatmul.msk.bf16.vlgmr.msra.gmra.mxu3 %vm68_vm1, %v373_v8 }
 0x2c1   :  { %v166_v48 = vpop.f32.mrf.mxu3 }
 0x2c2   :  { %v167_v50 = vadd.f32 %v314_v49, %v166_v48 }
 0x2c4   :  { %v171_v53 = vmax.f32 %v167_v50, 0.0 }
 0x2c9   :  { %v168_v51 = vpop.f32.mrf.mxu3 }
 0x2ca   :  { %v169_v52 = vadd.f32 %v314_v49, %v168_v51 }
 0x2cc   :  { %v172_v54 = vmax.f32 %v169_v52, 0.0 }
 0x2ce   :  { %v178_v55 = vpack.c.bf16 %v172_v54, %v171_v53 }
 0x2d0   :  { %301 = vmatmul.msk.bf16.vlgmr.msrb.gmra.mxu1 %vm43_vm0, %v178_v55 }
 0x34d   :  { %v203_v58 = vpop.f32.mrf.mxu1 }
 0x355   :  { %v205_v59 = vpop.f32.mrf.mxu1 }
 0x356   :  { %v208_v60 = vpack.c.bf16 %v205_v59, %v203_v58 }
 0x358   :  { %217 = vmatpush.bf16.msrb.mxu3 %v208_v60 }
 0x35b   :  { %302 = vmatmul.msk.bf16.vlgmr.msrb.gmra.mxu3 %vm68_vm1, %v373_v8 }
 0x3de   :  { %v219_v62 = vpop.f32.mrf.mxu3 }
 0x3df   :  { %v220_v63 = vadd.f32 %v315_v61, %v219_v62 }
 0x3e1   :  { %v224_v0 = vmul.f32 0.5, %v220_v63  ;;  %252 = vst.msk [vmem:[%s431_s5] sm:$0xff] %vm68_vm1, %v220_v63 }
 0x3e3   :  { %v226_v1 = vmul.f32 1.442695, %v224_v0 }
 0x3e5   :  { %320 = vpow2.f32 %v226_v1 }
 0x3e6   :  { %v221_v2 = vpop.f32.mrf.mxu3 }
 0x3e7   :  { %v222_v3 = vadd.f32 %v315_v61, %v221_v2 }
 0x3e9   :  { %v225_v5 = vmul.f32 0.5, %v222_v3  ;;  %253 = vst.msk [vmem:[%s431_s5 + $0x8] sm:$0xff] %vm68_vm1, %v222_v3 }
 0x3eb   :  { %v321_v6 = vpop.eup %320  ;;  %v228_v7 = vmul.f32 1.442695, %v225_v5 }
 0x3ec   :  { %v240_v8 = vmul.f32 %v321_v6, %v235_v4 }
 0x3ed   :  { %322 = vpow2.f32 %v228_v7 }
 0x3ee   :  { %244 = vrot.lane.b32.xlu2 %v240_v8, %s325_s2 }
 0x3f3   :  { %v323_v10 = vpop.eup %322 }
 0x3f4   :  { %v241_v11 = vmul.f32 %v323_v10, %v237_v9 }
 0x3f6   :  { %246 = vrot.lane.b32.xlu2 %v241_v11, %s325_s2 }
 0x448   :  { %v245_v12 = vpop.permute.xlu2 %244 }
 0x449   :  { %v250_v13 = vadd.f32 %v245_v12, %v220_v63 }
 0x44b   :  { %256 = vrot.lane.b32.xlu0 %v250_v13, %s326_s22 }
 0x450   :  { %v247_v14 = vpop.permute.xlu2 %246 }
 0x451   :  { %v251_v15 = vadd.f32 %v247_v14, %v222_v3 }
 0x453   :  { %258 = vrot.lane.b32.xlu1 %v251_v15, %s326_s22 }
 0x4bd   :  { %v257_v16 = vpop.permute.xlu0 %256 }
 0x4be   :  { %263 = vst.msk [vmem:[%s431_s5] sm:$0xff] %vm262_vm8, %v257_v16 }
 0x4c5   :  { %v259_v17 = vpop.permute.xlu1 %258 }
 0x4c6   :  { %264 = vst.msk [vmem:[%s431_s5 + $0x8] sm:$0xff] %vm262_vm8, %v259_v17 }

</bundles_post_ra>
